<compile_context>
chip_gen: v7x
topology: tpu7x:2x2x1
jax: 0.10.0
libtpu: 0.0.40
codegen_flags: <defaults>
</compile_context>

<pallas_src>
import jax
import jax.numpy as jnp
from jax import lax
from jax.experimental import pallas as pl
from jax.experimental.pallas import tpu as pltpu


def _round_up(x, m):
    return (x + m - 1) // m * m


def _mlp_kernel(x_ref, w1_ref, w2_ref, p_ref, o_ref):
    # x_ref: (TM, D); w1: (D, H); w2: (H, H); p_ref: (3, H) = [b1; b2; w3^T]; o_ref: (1, TM)
    x = x_ref[...]
    p = p_ref[...]
    b1 = p[0:1, :]
    b2 = p[1:2, :]
    w3t = p[2:3, :]

    h1 = jnp.dot(x, w1_ref[...], preferred_element_type=jnp.float32) + b1
    h1 = jnp.maximum(h1, 0.0)
    h2 = jnp.dot(h1.astype(w2_ref.dtype), w2_ref[...],
                 preferred_element_type=jnp.float32) + b2
    h2 = jnp.maximum(h2, 0.0)
    # Lane-dense final layer: (1, H) contracted with (TM, H) over H -> (1, TM).
    q = lax.dot_general(
        w3t, h2.astype(w3t.dtype),
        dimension_numbers=(((1,), (1,)), ((), ())),
        preferred_element_type=jnp.float32,
    )
    o_ref[...] = q.astype(o_ref.dtype)


def _pick_tile(M, tile_m):
    """Row-tile size and grid length.  Multi-step grids are 128-aligned and (when possible)
    have an even number of steps so both v7x TensorCores get balanced work."""
    if M <= tile_m:
        return M, 1                      # single full-dim block (legal for any M)
    t = _round_up(tile_m, 128)
    n = pl.cdiv(M, t)
    if n > 1 and n % 2 == 1:
        n += 1                           # prefer an even grid for 2-TC chips
    t = _round_up(pl.cdiv(M, n), 128)
    n = pl.cdiv(M, t)
    return t, n


def stack_q_value_head(x, w1, b1, w2, b2, w3, b3, *, tile_m=1024):
    """x: [B, S, D]; w1:[D,H] b1:[1,H] w2:[H,H] b2:[1,H] w3:[H,1] b3:[1,1] -> q:[B,S] f32."""
    B, S, D = x.shape
    H = w1.shape[1]
    M = B * S

    # Compute/stream dtype follows x (no extra conversion pass over x).
    dt = x.dtype
    if dt not in (jnp.dtype(jnp.bfloat16), jnp.dtype(jnp.float32)):
        dt = jnp.dtype(jnp.float32)
    x2 = x.reshape(M, D).astype(dt)                    # no-op when already dt

    w1c = w1.astype(dt)                                # tiny (D,H); cheap cast
    w2c = w2.astype(dt)
    # Pack b1, b2, w3^T into one resident (3, H) operand.
    params = jnp.concatenate(
        [b1.reshape(1, H), b2.reshape(1, H), w3.reshape(1, H)], axis=0
    ).astype(dt)

    tile, n_tiles = _pick_tile(M, tile_m)
    grid = (n_tiles,)

    # VMEM budget: double-buffered x tiles dominate; cap below the chip's physical VMEM
    # (v7x has only 64 MiB per TensorCore).
    isz = jnp.dtype(dt).itemsize
    est = (
        2 * tile * D * isz                                   # x tiles (double buffered)
        + 2 * 8 * max(tile, 128) * 4                         # output tiles (sublane padded)
        + 2 * (_round_up(D, 8) * 128 + 128 * 128 + 8 * 128) * isz   # resident w1, w2, params
    )
    try:
        phys = int(pltpu.get_tpu_info().vmem_capacity_bytes)
    except Exception:
        phys = 64 * 1024 * 1024
    cap = min(56 * 1024 * 1024, (phys * 7) // 8)
    vmem_limit = int(min(cap, max(32 * 1024 * 1024, 2 * est)))

    out = pl.pallas_call(
        _mlp_kernel,
        out_shape=jax.ShapeDtypeStruct((1, M), jnp.float32),
        grid_spec=pltpu.PrefetchScalarGridSpec(
            num_scalar_prefetch=0,
            grid=grid,
            in_specs=[
                pl.BlockSpec((tile, D), lambda i: (i, 0)),   # x rows (streamed, partial last tile OK)
                pl.BlockSpec((D, H), lambda i: (0, 0)),      # W1 (resident)
                pl.BlockSpec((H, H), lambda i: (0, 0)),      # W2 (resident)
                pl.BlockSpec((3, H), lambda i: (0, 0)),      # [b1; b2; w3^T] (resident)
            ],
            out_specs=pl.BlockSpec((1, tile), lambda i: (0, i)),   # lane-dense output
        ),
        compiler_params=pltpu.CompilerParams(
            dimension_semantics=("parallel",),
            vmem_limit_bytes=vmem_limit,
        ),
    )(x2, w1c, w2c, params)

    # Fold the scalar output bias in the wrapper (tiny [B,S] op).
    q = out[0, :] + jnp.reshape(b3, ()).astype(jnp.float32)
    return q.reshape(B, S)


def _reference(x, w1, b1, w2, b2, w3, b3):
    h1 = jnp.maximum(x @ w1 + b1.reshape(1, -1), 0.0)
    h2 = jnp.maximum(h1 @ w2 + b2.reshape(1, -1), 0.0)
    return (h2 @ w3 + b3.reshape(1, 1)).squeeze(-1)


def _make_params(key, D, H):
    k1, k2, k3, kb1, kb2, kb3 = jax.random.split(key, 6)
    w1 = jax.random.normal(k1, (D, H), dtype=jnp.float32) * (1.0 / jnp.sqrt(D))
    b1 = jax.random.normal(kb1, (1, H), dtype=jnp.float32) * 0.01
    w2 = jax.random.normal(k2, (H, H), dtype=jnp.float32) * (1.0 / jnp.sqrt(H))
    b2 = jax.random.normal(kb2, (1, H), dtype=jnp.float32) * 0.01
    w3 = jax.random.normal(k3, (H, 1), dtype=jnp.float32) * (1.0 / jnp.sqrt(H))
    b3 = jax.random.normal(kb3, (1, 1), dtype=jnp.float32) * 0.01
    return w1, b1, w2, b2, w3, b3


if __name__ == "__main__":
    key = jax.random.PRNGKey(0)
    kp, kx1, kx2 = jax.random.split(key, 3)

    D, H = 1020, 32
    w1, b1, w2, b2, w3, b3 = _make_params(kp, D, H)

    # Case 1: the module's shape [B, 50, 1020] with B=2 -> M=100 rows,
    # single full-dim tile (100 not a multiple of 8, 1020 not a multiple of 128).
    B1, S1 = 2, 50
    x1 = jax.random.normal(kx1, (B1, S1, D), dtype=jnp.float32)
    q1 = jax.block_until_ready(stack_q_value_head(x1, w1, b1, w2, b2, w3, b3))
    q1_ref = _reference(x1, w1, b1, w2, b2, w3, b3)
    assert q1.shape == (B1, S1), q1.shape
    assert jnp.allclose(q1, q1_ref, atol=1e-3, rtol=1e-3), "case1 mismatch vs reference"

    # Case 2: larger batch exercising the multi-step pipelined grid with a partial last
    # tile and an even grid (M = 1280 rows -> tile = 640, grid = (2,)).
    B2, S2 = 4, 320
    x2 = jax.random.normal(kx2, (B2, S2, D), dtype=jnp.float32)
    q2 = jax.block_until_ready(stack_q_value_head(x2, w1, b1, w2, b2, w3, b3))
    q2_ref = _reference(x2, w1, b1, w2, b2, w3, b3)
    assert q2.shape == (B2, S2), q2.shape
    assert jnp.allclose(q2, q2_ref, atol=1e-3, rtol=1e-3), "case2 mismatch vs reference"

    print("KERNEL_OK")
</pallas_src>

<mosaic_0001>
module attributes {stable_mosaic.version = 11 : i64} {
  func.func @_mlp_kernel(%arg0: i32, %arg1: memref<100x1020xf32, #tpu.memory_space<vmem>>, %arg2: memref<1020x32xf32, #tpu.memory_space<vmem>>, %arg3: memref<32x32xf32, #tpu.memory_space<vmem>>, %arg4: memref<3x32xf32, #tpu.memory_space<vmem>>, %arg5: memref<1x100xf32, #tpu.memory_space<vmem>>) attributes {dimension_semantics = [#tpu.dimension_semantics<parallel>], iteration_bounds = array<i64: 1>, scalar_prefetch = 0 : i64, scratch_operands = 0 : i64, tpu.core_type = #tpu.core_type<tc>, window_params = [{transform_indices = @transform_0, window_bounds = array<i64: 100, 1020>}, {pipeline_mode = #tpu.pipeline_mode<synchronous>, transform_indices = @transform_1, window_bounds = array<i64: 1020, 32>}, {pipeline_mode = #tpu.pipeline_mode<synchronous>, transform_indices = @transform_2, window_bounds = array<i64: 32, 32>}, {pipeline_mode = #tpu.pipeline_mode<synchronous>, transform_indices = @transform_3, window_bounds = array<i64: 3, 32>}, {transform_indices = @transform_4, window_bounds = array<i64: 1, 100>}]} {
    %c0 = arith.constant 0 : index
    %c0_0 = arith.constant 0 : index
    %0 = vector.load %arg1[%c0, %c0_0] : memref<100x1020xf32, #tpu.memory_space<vmem>>, vector<100x1020xf32>
    %c0_1 = arith.constant 0 : index
    %c0_2 = arith.constant 0 : index
    %1 = vector.load %arg4[%c0_1, %c0_2] : memref<3x32xf32, #tpu.memory_space<vmem>>, vector<3x32xf32>
    %2 = vector.extract_strided_slice %1 {offsets = [0, 0], sizes = [1, 32], strides = [1, 1]} : vector<3x32xf32> to vector<1x32xf32>
    %3 = vector.extract_strided_slice %1 {offsets = [1, 0], sizes = [1, 32], strides = [1, 1]} : vector<3x32xf32> to vector<1x32xf32>
    %4 = vector.extract_strided_slice %1 {offsets = [2, 0], sizes = [1, 32], strides = [1, 1]} : vector<3x32xf32> to vector<1x32xf32>
    %c0_3 = arith.constant 0 : index
    %c0_4 = arith.constant 0 : index
    %5 = vector.load %arg2[%c0_3, %c0_4] : memref<1020x32xf32, #tpu.memory_space<vmem>>, vector<1020x32xf32>
    %cst = arith.constant dense<0.000000e+00> : vector<100x32xf32>
    %6 = tpu.matmul %0, %5, %cst {dimension_numbers = #tpu.dot_dimension_numbers<[1], [0], [0], [1], [0, 0, 1, 1], [], []>} : vector<100x1020xf32>, vector<1020x32xf32>, vector<100x32xf32> -> vector<100x32xf32>
    %7 = vector.broadcast %2 : vector<1x32xf32> to vector<100x32xf32>
    %8 = arith.addf %6, %7 : vector<100x32xf32>
    %cst_5 = arith.constant 0.000000e+00 : f32
    %9 = vector.broadcast %cst_5 : f32 to vector<100x32xf32>
    %10 = arith.maximumf %8, %9 : vector<100x32xf32>
    %c0_6 = arith.constant 0 : index
    %c0_7 = arith.constant 0 : index
    %11 = vector.load %arg3[%c0_6, %c0_7] : memref<32x32xf32, #tpu.memory_space<vmem>>, vector<32x32xf32>
    %cst_8 = arith.constant dense<0.000000e+00> : vector<100x32xf32>
    %12 = tpu.matmul %10, %11, %cst_8 {dimension_numbers = #tpu.dot_dimension_numbers<[1], [0], [0], [1], [0, 0, 1, 1], [], []>} : vector<100x32xf32>, vector<32x32xf32>, vector<100x32xf32> -> vector<100x32xf32>
    %13 = vector.broadcast %3 : vector<1x32xf32> to vector<100x32xf32>
    %14 = arith.addf %12, %13 : vector<100x32xf32>
    %cst_9 = arith.constant 0.000000e+00 : f32
    %15 = vector.broadcast %cst_9 : f32 to vector<100x32xf32>
    %16 = arith.maximumf %14, %15 : vector<100x32xf32>
    %cst_10 = arith.constant dense<0.000000e+00> : vector<1x100xf32>
    %17 = tpu.matmul %4, %16, %cst_10 {dimension_numbers = #tpu.dot_dimension_numbers<[1], [1], [0], [0], [0, 0, 1, 0], [], []>} : vector<1x32xf32>, vector<100x32xf32>, vector<1x100xf32> -> vector<1x100xf32>
    %c0_11 = arith.constant 0 : index
    %c0_12 = arith.constant 0 : index
    %18 = vector.load %arg5[%c0_11, %c0_12] : memref<1x100xf32, #tpu.memory_space<vmem>>, vector<1x100xf32>
    tpu.vector_store %arg5[%c0_11, %c0_12], %17 {strides = array<i32>} : memref<1x100xf32, #tpu.memory_space<vmem>>, vector<1x100xf32>,
    return
  }
  func.func @transform_0(%arg0: i32) -> (i32, i32) {
    %c0_i32 = arith.constant 0 : i32
    %c0_i32_0 = arith.constant 0 : i32
    return %arg0, %c0_i32 : i32, i32
  }
  func.func @transform_1(%arg0: i32) -> (i32, i32) {
    %c0_i32 = arith.constant 0 : i32
    %c0_i32_0 = arith.constant 0 : i32
    %c0_i32_1 = arith.constant 0 : i32
    return %c0_i32, %c0_i32_0 : i32, i32
  }
  func.func @transform_2(%arg0: i32) -> (i32, i32) {
    %c0_i32 = arith.constant 0 : i32
    %c0_i32_0 = arith.constant 0 : i32
    %c0_i32_1 = arith.constant 0 : i32
    return %c0_i32, %c0_i32_0 : i32, i32
  }
  func.func @transform_3(%arg0: i32) -> (i32, i32) {
    %c0_i32 = arith.constant 0 : i32
    %c0_i32_0 = arith.constant 0 : i32
    %c0_i32_1 = arith.constant 0 : i32
    return %c0_i32, %c0_i32_0 : i32, i32
  }
  func.func @transform_4(%arg0: i32) -> (i32, i32) {
    %c0_i32 = arith.constant 0 : i32
    %c0_i32_0 = arith.constant 0 : i32
    return %c0_i32, %arg0 : i32, i32
  }
}

</mosaic_0001>

<bundles_post_ra>
// kernel: tpu_custom_call.1
= control target key start
LH: loop header
LB: loop body
LE: loop exit
PB: predicated region body
PF: predicated region fallthrough
CT: control target
= control target key end

     0   :  { %s2717_s0 = inlined_call_operand.vmem [shape: f32[100,1020], index: 0, kind: input, shape index: {}]   ;;  %s2718_s1 = inlined_call_operand.vmem [shape: f32[1020,32], index: 1, kind: input, shape index: {}]   ;;  %s2719_s2 = inlined_call_operand.vmem [shape: f32[32,32], index: 2, kind: input, shape index: {}]   ;;  %s2720_s3 = inlined_call_operand.vmem [shape: f32[3,32], index: 3, kind: input, shape index: {}]   ;;  %s2721_s4 = inlined_call_operand.hbm [shape: f32[1,100], index: 4, kind: output, shape index: {}]  }
   0x1   :  { %v139_v0 = vld [vmem:[%s2718_s1 + $0x80] sm:$0xff]  ;;  %v140_v1 = vld [vmem:[%s2718_s1 + $0x88] sm:$0xff]  ;;  %v141_v5 = vld [vmem:[%s2718_s1 + $0x90] sm:$0xff] }
   0x2   :  { %v123_v2 = vld [vmem:[%s2718_s1] sm:$0xff]  ;;  %v1584_v3 = vpack.c.bf16 %v140_v1, %v139_v0  ;;  %v124_v4 = vld [vmem:[%s2718_s1 + $0x8] sm:$0xff]  ;;  %v142_v6 = vld [vmem:[%s2718_s1 + $0x98] sm:$0xff] }
   0x3   :  { %v1586_v7 = vpack.c.bf16 %v124_v4, %v123_v2  ;;  %v1588_v8 = vpack.c.bf16 %v142_v6, %v141_v5  ;;  %v125_v9 = vld [vmem:[%s2718_s1 + $0x10] sm:$0xff]  ;;  %v126_v10 = vld [vmem:[%s2718_s1 + $0x18] sm:$0xff]  ;;  %v143_v11 = vld [vmem:[%s2718_s1 + $0xa0] sm:$0xff] }
   0x4   :  { %1743 = vmatprep.subr.bf16.mxu1 %v1584_v3  ;;  %1585 = vmatprep.subr.bf16.mxu0 %v1584_v3  ;;  %v144_v12 = vld [vmem:[%s2718_s1 + $0xa8] sm:$0xff]  ;;  %v1590_v13 = vpack.c.bf16 %v126_v10, %v125_v9  ;;  %v127_v15 = vld [vmem:[%s2718_s1 + $0x20] sm:$0xff]  ;;  %v145_v17 = vld [vmem:[%s2718_s1 + $0xb0] sm:$0xff] }
   0x5   :  { %1751 = vmatpush3.bf16.msra.mxu1 %v1586_v7  ;;  %1587 = vmatpush3.bf16.msra.mxu0 %v1586_v7  ;;  %v1592_v14 = vpack.c.bf16 %v144_v12, %v143_v11  ;;  %v128_v16 = vld [vmem:[%s2718_s1 + $0x28] sm:$0xff]  ;;  %v146_v18 = vld [vmem:[%s2718_s1 + $0xb8] sm:$0xff]  ;;  %v129_v21 = vld [vmem:[%s2718_s1 + $0x30] sm:$0xff] }
   0x6   :  { %1744 = vmatprep.subr.bf16.mxu1 %v1588_v8  ;;  %1589 = vmatprep.subr.bf16.mxu0 %v1588_v8  ;;  %v1594_v19 = vpack.c.bf16 %v128_v16, %v127_v15  ;;  %v1596_v20 = vpack.c.bf16 %v146_v18, %v145_v17  ;;  %v130_v22 = vld [vmem:[%s2718_s1 + $0x38] sm:$0xff]  ;;  %v147_v23 = vld [vmem:[%s2718_s1 + $0xc0] sm:$0xff]  ;;  %v148_v24 = vld [vmem:[%s2718_s1 + $0xc8] sm:$0xff] }
   0x7   :  { %v83_v25 = vld [vmem:[%s2717_s0 + $0x208] sm:$0xff]  ;;  %v1598_v26 = vpack.c.bf16 %v130_v22, %v129_v21  ;;  %v1600_v28 = vpack.c.bf16 %v148_v24, %v147_v23  ;;  %v131_v29 = vld [vmem:[%s2718_s1 + $0x40] sm:$0xff]  ;;  %v149_v31 = vld [vmem:[%s2718_s1 + $0xd0] sm:$0xff] }
   0x8   :  { %403 = vmatprep.mubr.f32.mxu1 %v83_v25  ;;  %v19_v27 = vld [vmem:[%s2717_s0 + $0x8] sm:$0xff]  ;;  %v150_v32 = vld [vmem:[%s2718_s1 + $0xd8] sm:$0xff]  ;;  %v133_v35 = vld [vmem:[%s2718_s1 + $0x50] sm:$0xff] }
   0x9   :  { %1752 = vmatpush3.bf16.msra.mxu1 %v1590_v13  ;;  %1591 = vmatpush3.bf16.msra.mxu0 %v1590_v13  ;;  %v132_v30 = vld [vmem:[%s2718_s1 + $0x48] sm:$0xff]  ;;  %v1604_v34 = vpack.c.bf16 %v150_v32, %v149_v31  ;;  %v134_v36 = vld [vmem:[%s2718_s1 + $0x58] sm:$0xff]  ;;  %v151_v37 = vld [vmem:[%s2718_s1 + $0xe0] sm:$0xff] }
   0xa   :  { %1745 = vmatprep.subr.bf16.mxu1 %v1592_v14  ;;  %1593 = vmatprep.subr.bf16.mxu0 %v1592_v14  ;;  %v1602_v33 = vpack.c.bf16 %v132_v30, %v131_v29  ;;  %v152_v38 = vld [vmem:[%s2718_s1 + $0xe8] sm:$0xff]  ;;  %v1606_v39 = vpack.c.bf16 %v134_v36, %v133_v35  ;;  %v135_v41 = vld [vmem:[%s2718_s1 + $0x60] sm:$0xff]  ;;  %v153_v43 = vld [vmem:[%s2718_s1 + $0xf0] sm:$0xff] }
   0xb   :  { %363 = vmatprep.mubr.f32.mxu0 %v19_v27  ;;  %v1608_v40 = vpack.c.bf16 %v152_v38, %v151_v37  ;;  %v136_v42 = vld [vmem:[%s2718_s1 + $0x68] sm:$0xff]  ;;  %v154_v44 = vld [vmem:[%s2718_s1 + $0xf8] sm:$0xff]  ;;  %v137_v47 = vld [vmem:[%s2718_s1 + $0x70] sm:$0xff] }
   0xc   :  { %v1610_v45 = vpack.c.bf16 %v136_v42, %v135_v41  ;;  %v1612_v46 = vpack.c.bf16 %v154_v44, %v153_v43  ;;  %v138_v48 = vld [vmem:[%s2718_s1 + $0x78] sm:$0xff]  ;;  %v171_v49 = vld [vmem:[%s2718_s1 + $0x180] sm:$0xff]  ;;  %v172_v50 = vld [vmem:[%s2718_s1 + $0x188] sm:$0xff] }
   0xd   :  { %1753 = vmatpush3.bf16.msra.mxu1 %v1594_v19  ;;  %1595 = vmatpush3.bf16.msra.mxu0 %v1594_v19  ;;  %v203_v51 = vld [vmem:[%s2718_s1 + $0x280] sm:$0xff]  ;;  %v204_v52 = vld [vmem:[%s2718_s1 + $0x288] sm:$0xff]  ;;  %v1614_v53 = vpack.c.bf16 %v138_v48, %v137_v47  ;;  %v1616_v55 = vpack.c.bf16 %v172_v50, %v171_v49  ;;  %v173_v60 = vld [vmem:[%s2718_s1 + $0x190] sm:$0xff] }
   0xe   :  { %1746 = vmatprep.subr.bf16.mxu1 %v1596_v20  ;;  %1597 = vmatprep.subr.bf16.mxu0 %v1596_v20  ;;  %v155_v54 = vld [vmem:[%s2718_s1 + $0x100] sm:$0xff]  ;;  %v156_v56 = vld [vmem:[%s2718_s1 + $0x108] sm:$0xff]  ;;  %v1648_v57 = vpack.c.bf16 %v204_v52, %v203_v51  ;;  %v174_v61 = vld [vmem:[%s2718_s1 + $0x198] sm:$0xff] }
   0xf   :  { %v187_v58 = vld [vmem:[%s2718_s1 + $0x200] sm:$0xff]  ;;  %v188_v59 = vld [vmem:[%s2718_s1 + $0x208] sm:$0xff]  ;;  %v205_v62 = vld [vmem:[%s2718_s1 + $0x290] sm:$0xff]  ;;  %v1618_v1 = vpack.c.bf16 %v156_v56, %v155_v54  ;;  %v1620_v5 = vpack.c.bf16 %v174_v61, %v173_v60 }
  0x10   :  { %v206_v63 = vld [vmem:[%s2718_s1 + $0x298] sm:$0xff]  ;;  %v82_v0 = vld [vmem:[%s2717_s0 + $0x200] sm:$0xff]  ;;  %v1650_v3 = vpack.c.bf16 %v188_v59, %v187_v58  ;;  %v157_v4 = vld [vmem:[%s2718_s1 + $0x110] sm:$0xff] }
  0x11   :  { %1754 = vmatpush3.bf16.msra.mxu1 %v1598_v26  ;;  %1599 = vmatpush3.bf16.msra.mxu0 %v1598_v26  ;;  %v18_v2 = vld [vmem:[%s2717_s0] sm:$0xff]  ;;  %v158_v6 = vld [vmem:[%s2718_s1 + $0x118] sm:$0xff]  ;;  %v189_v7 = vld [vmem:[%s2718_s1 + $0x210] sm:$0xff]  ;;  %v1652_v10 = vpack.c.bf16 %v206_v63, %v205_v62 }
  0x12   :  { %1747 = vmatprep.subr.bf16.mxu1 %v1600_v28  ;;  %1601 = vmatprep.subr.bf16.mxu0 %v1600_v28  ;;  %v190_v8 = vld [vmem:[%s2718_s1 + $0x218] sm:$0xff]  ;;  %v27_v9 = vld [vmem:[%s2717_s0 + $0x48] sm:$0xff]  ;;  %v175_v11 = vld [vmem:[%s2718_s1 + $0x1a0] sm:$0xff]  ;;  %v1622_v16 = vpack.c.bf16 %v158_v6, %v157_v4 }
  0x13   :  { %v176_v12 = vld [vmem:[%s2718_s1 + $0x1a8] sm:$0xff]  ;;  %v207_v13 = vld [vmem:[%s2718_s1 + $0x2a0] sm:$0xff]  ;;  %v1654_v18 = vpack.c.bf16 %v190_v8, %v189_v7  ;;  %v177_v27 = vld [vmem:[%s2718_s1 + $0x1b0] sm:$0xff] }
  0x14   :  { %v208_v14 = vld [vmem:[%s2718_s1 + $0x2a8] sm:$0xff]  ;;  %v26_v17 = vld [vmem:[%s2717_s0 + $0x40] sm:$0xff]  ;;  %v1624_v21 = vpack.c.bf16 %v176_v12, %v175_v11  ;;  %v178_v28 = vld [vmem:[%s2718_s1 + $0x1b8] sm:$0xff] }
  0x15   :  { %1755 = vmatpush3.bf16.msra.mxu1 %v1602_v33  ;;  %1603 = vmatpush3.bf16.msra.mxu0 %v1602_v33  ;;  %v91_v15 = vld [vmem:[%s2717_s0 + $0x248] sm:$0xff]  ;;  %v159_v19 = vld [vmem:[%s2718_s1 + $0x120] sm:$0xff]  ;;  %v1656_v26 = vpack.c.bf16 %v208_v14, %v207_v13  ;;  %v209_v29 = vld [vmem:[%s2718_s1 + $0x2b0] sm:$0xff]  ;;  %v1628_v37 = vpack.c.bf16 %v178_v28, %v177_v27 }
  0x16   :  { %1748 = vmatprep.subr.bf16.mxu1 %v1604_v34  ;;  %1605 = vmatprep.subr.bf16.mxu0 %v1604_v34  ;;  %v90_v20 = vld [vmem:[%s2717_s0 + $0x240] sm:$0xff]  ;;  %v160_v22 = vld [vmem:[%s2718_s1 + $0x128] sm:$0xff]  ;;  %v210_v30 = vld [vmem:[%s2718_s1 + $0x2b8] sm:$0xff] }
  0x17   :  { %v191_v23 = vld [vmem:[%s2718_s1 + $0x220] sm:$0xff]  ;;  %v192_v24 = vld [vmem:[%s2718_s1 + $0x228] sm:$0xff]  ;;  %v1626_v32 = vpack.c.bf16 %v160_v22, %v159_v19  ;;  %v161_v35 = vld [vmem:[%s2718_s1 + $0x130] sm:$0xff]  ;;  %v1660_v42 = vpack.c.bf16 %v210_v30, %v209_v29 }
  0x18   :  { %v35_v25 = vld [vmem:[%s2717_s0 + $0x88] sm:$0xff]  ;;  %v34_v33 = vld [vmem:[%s2717_s0 + $0x80] sm:$0xff]  ;;  %v1658_v34 = vpack.c.bf16 %v192_v24, %v191_v23  ;;  %v162_v38 = vld [vmem:[%s2718_s1 + $0x138] sm:$0xff] }
  0x19   :  { %1756 = vmatpush3.bf16.msra.mxu1 %v1606_v39  ;;  %1607 = vmatpush3.bf16.msra.mxu0 %v1606_v39  ;;  %v99_v31 = vld [vmem:[%s2717_s0 + $0x288] sm:$0xff]  ;;  %v98_v36 = vld [vmem:[%s2717_s0 + $0x280] sm:$0xff]  ;;  %v193_v39 = vld [vmem:[%s2718_s1 + $0x230] sm:$0xff]  ;;  %v1630_v48 = vpack.c.bf16 %v162_v38, %v161_v35 }
  0x1a   :  { %1749 = vmatprep.subr.bf16.mxu1 %v1608_v40  ;;  %1609 = vmatprep.subr.bf16.mxu0 %v1608_v40  ;;  %v194_v40 = vld [vmem:[%s2718_s1 + $0x238] sm:$0xff]  ;;  %v43_v41 = vld [vmem:[%s2717_s0 + $0xc8] sm:$0xff]  ;;  %v179_v43 = vld [vmem:[%s2718_s1 + $0x1c0] sm:$0xff] }
  0x1b   :  { %v180_v44 = vld [vmem:[%s2718_s1 + $0x1c8] sm:$0xff]  ;;  %v42_v49 = vld [vmem:[%s2717_s0 + $0xc0] sm:$0xff]  ;;  %v1662_v50 = vpack.c.bf16 %v194_v40, %v193_v39  ;;  %v181_v59 = vld [vmem:[%s2718_s1 + $0x1d0] sm:$0xff] }
  0x1c   :  { %v107_v47 = vld [vmem:[%s2717_s0 + $0x2c8] sm:$0xff]  ;;  %v163_v51 = vld [vmem:[%s2718_s1 + $0x140] sm:$0xff]  ;;  %v182_v60 = vld [vmem:[%s2718_s1 + $0x1d8] sm:$0xff] }
  0x1d   :  { %1757 = vmatpush3.bf16.msra.mxu1 %v1610_v45  ;;  %1611 = vmatpush3.bf16.msra.mxu0 %v1610_v45  ;;  %v211_v45 = vld [vmem:[%s2718_s1 + $0x2c0] sm:$0xff]  ;;  %v164_v54 = vld [vmem:[%s2718_s1 + $0x148] sm:$0xff]  ;;  %v213_v61 = vld [vmem:[%s2718_s1 + $0x2d0] sm:$0xff] }
  0x1e   :  { %1750 = vmatprep.subr.bf16.mxu1 %v1612_v46  ;;  %1613 = vmatprep.subr.bf16.mxu0 %v1612_v46  ;;  %v212_v46 = vld [vmem:[%s2718_s1 + $0x2c8] sm:$0xff]  ;;  %v106_v52 = vld [vmem:[%s2717_s0 + $0x2c0] sm:$0xff]  ;;  %v214_v62 = vld [vmem:[%s2718_s1 + $0x2d8] sm:$0xff] }
  0x1f   :  { %v196_v56 = vld [vmem:[%s2718_s1 + $0x248] sm:$0xff]  ;;  %v1664_v58 = vpack.c.bf16 %v212_v46, %v211_v45  ;;  %v114_v4 = vld [vmem:[%s2717_s0 + $0x300] sm:$0xf]  ;;  %v166_v6 = vld [vmem:[%s2718_s1 + $0x158] sm:$0xff] }
  0x20   :  { %v115_v63 = vld [vmem:[%s2717_s0 + $0x308] sm:$0xf]  ;;  %v197_v7 = vld [vmem:[%s2718_s1 + $0x250] sm:$0xff]  ;;  %v198_v8 = vld [vmem:[%s2718_s1 + $0x258] sm:$0xff] }
  0x21   :  { %1758 = vmatpush3.bf16.msra.mxu1 %v1614_v53  ;;  %1615 = vmatpush3.bf16.msra.mxu0 %v1614_v53  ;;  %v1632_v53 = vpack.c.bf16 %v180_v44, %v179_v43  ;;  %v183_v11 = vld [vmem:[%s2718_s1 + $0x1e0] sm:$0xff]  ;;  %v184_v12 = vld [vmem:[%s2718_s1 + $0x1e8] sm:$0xff]  ;;  %v186_v27 = vld [vmem:[%s2718_s1 + $0x1f8] sm:$0xff] }
  0x22   :  { %1617 = vmatprep.subr.bf16.mxu1 %v1616_v55  ;;  %1649 = vmatprep.subr.bf16.mxu0 %v1648_v57  ;;  %v195_v55 = vld [vmem:[%s2718_s1 + $0x240] sm:$0xff]  ;;  %v51_v57 = vld [vmem:[%s2717_s0 + $0x108] sm:$0xff]  ;;  %v217_v28 = vld [vmem:[%s2718_s1 + $0x2f0] sm:$0xff] }
  0x23   :  { %v215_v13 = vld [vmem:[%s2718_s1 + $0x2e0] sm:$0xff]  ;;  %v216_v14 = vld [vmem:[%s2718_s1 + $0x2e8] sm:$0xff]  ;;  %v218_v29 = vld [vmem:[%s2718_s1 + $0x2f8] sm:$0xff] }
  0x24   :  { %404 = vmatmul.mubr.f32.vlgmr.msra.gmra.mrb[0].mxu1 %v82_v0  ;;  %364 = vmatmul.mubr.f32.vlgmr.msra.gmra.mrb[0].mxu0 %v18_v2  ;;  %v1634_v0 = vpack.c.bf16 %v164_v54, %v163_v51  ;;  %v1666_v2 = vpack.c.bf16 %v196_v56, %v195_v55  ;;  %v167_v19 = vld [vmem:[%s2718_s1 + $0x160] sm:$0xff]  ;;  %v200_v23 = vld [vmem:[%s2718_s1 + $0x268] sm:$0xff]  ;;  %v170_v35 = vld [vmem:[%s2718_s1 + $0x178] sm:$0xff]  ;;  %v1676_v39 = vpack.c.bf16 %v218_v29, %v217_v28 }
  0x25   :  { %1619 = vmatpush3.bf16.msra.mxu1 %v1618_v1  ;;  %1651 = vmatpush3.bf16.msra.mxu0 %v1650_v3  ;;  %v50_v1 = vld [vmem:[%s2717_s0 + $0x100] sm:$0xff]  ;;  %v165_v3 = vld [vmem:[%s2718_s1 + $0x150] sm:$0xff]  ;;  %v67_v24 = vld [vmem:[%s2717_s0 + $0x188] sm:$0xff] }
  0x26   :  { %1621 = vmatprep.subr.bf16.mxu1 %v1620_v5  ;;  %368 = vmatprep.mubr.f32.mxu0 %v27_v9  ;;  %v1636_v5 = vpack.c.bf16 %v182_v60, %v181_v59  ;;  %v59_v9 = vld [vmem:[%s2717_s0 + $0x148] sm:$0xff]  ;;  %v199_v22 = vld [vmem:[%s2718_s1 + $0x260] sm:$0xff]  ;;  %v20_v51 = vld [vmem:[%s2717_s0 + $0x10] sm:$0xff] }
  0x27   :  { %1653 = vmatprep.subr.bf16.mxu0 %v1652_v10  ;;  %408 = vmatprep.mubr.f32.mxu1 %v91_v15  ;;  %v1668_v10 = vpack.c.bf16 %v214_v62, %v213_v61  ;;  %v21_v15 = vld [vmem:[%s2717_s0 + $0x18] sm:$0xff]  ;;  %v75_v38 = vld [vmem:[%s2717_s0 + $0x1c8] sm:$0xff]  ;;  %v235_v40 = vld [vmem:[%s2718_s1 + $0x380] sm:$0xff] }
  0x28   :  { %369 = vmatmul.mubr.f32.gmra.mrb[2].mxu0 %v26_v17  ;;  %409 = vmatmul.mubr.f32.gmra.mrb[2].mxu1 %v90_v20  ;;  %v58_v17 = vld [vmem:[%s2717_s0 + $0x140] sm:$0xff]  ;;  %v1640_v20 = vpack.c.bf16 %v184_v12, %v183_v11  ;;  %v29_v54 = vld [vmem:[%s2717_s0 + $0x58] sm:$0xff]  ;;  %v31_v56 = vld [vmem:[%s2717_s0 + $0x68] sm:$0xff] }
  0x29   :  { %1623 = vmatpush3.bf16.msra.mxu1 %v1622_v16  ;;  %1655 = vmatpush3.bf16.msra.mxu0 %v1654_v18  ;;  %v1638_v16 = vpack.c.bf16 %v166_v6, %v165_v3  ;;  %v1670_v18 = vpack.c.bf16 %v198_v8, %v197_v7  ;;  %v74_v43 = vld [vmem:[%s2717_s0 + $0x1c0] sm:$0xff]  ;;  %v240_v60 = vld [vmem:[%s2718_s1 + $0x3a8] sm:$0xff]  ;;  %v28_v61 = vld [vmem:[%s2717_s0 + $0x50] sm:$0xff] }
  0x2a   :  { %1625 = vmatprep.subr.bf16.mxu1 %v1624_v21  ;;  %373 = vmatprep.mubr.f32.mxu0 %v35_v25  ;;  %v168_v21 = vld [vmem:[%s2718_s1 + $0x168] sm:$0xff]  ;;  %v1672_v25 = vpack.c.bf16 %v216_v14, %v215_v13  ;;  %v219_v46 = vld [vmem:[%s2718_s1 + $0x300] sm:$0xff]  ;;  %v242_v6 = vld [vmem:[%s2718_s1 + $0x3b8] sm:$0xff] }
  0x2b   :  { %1657 = vmatprep.subr.bf16.mxu0 %v1656_v26  ;;  %413 = vmatprep.mubr.f32.mxu1 %v99_v31  ;;  %v185_v26 = vld [vmem:[%s2718_s1 + $0x1f0] sm:$0xff]  ;;  %v1642_v30 = vpack.c.bf16 %v168_v21, %v167_v19  ;;  %v66_v31 = vld [vmem:[%s2717_s0 + $0x180] sm:$0xff]  ;;  %v226_v14 = vld [vmem:[%s2718_s1 + $0x338] sm:$0xff] }
  0x2c   :  { %374 = vmatmul.mubr.f32.gmra.mrb[4].mxu0 %v34_v33  ;;  %414 = vmatmul.mubr.f32.gmra.mrb[4].mxu1 %v98_v36  ;;  %v169_v33 = vld [vmem:[%s2718_s1 + $0x170] sm:$0xff]  ;;  %v239_v59 = vld [vmem:[%s2718_s1 + $0x3a0] sm:$0xff]  ;;  %v53_v19 = vld [vmem:[%s2717_s0 + $0x118] sm:$0xff] }
  0x2d   :  { %1627 = vmatpush3.bf16.msra.mxu1 %v1626_v32  ;;  %1659 = vmatpush3.bf16.msra.mxu0 %v1658_v34  ;;  %v1674_v32 = vpack.c.bf16 %v200_v23, %v199_v22  ;;  %v1644_v34 = vpack.c.bf16 %v186_v27, %v185_v26  ;;  %v201_v36 = vld [vmem:[%s2718_s1 + $0x270] sm:$0xff]  ;;  %v30_v62 = vld [vmem:[%s2717_s0 + $0x60] sm:$0xff] }
  0x2e   :  { %1629 = vmatprep.subr.bf16.mxu1 %v1628_v37  ;;  %378 = vmatprep.mubr.f32.mxu0 %v43_v41  ;;  %v202_v37 = vld [vmem:[%s2718_s1 + $0x278] sm:$0xff]  ;;  %v236_v41 = vld [vmem:[%s2718_s1 + $0x388] sm:$0xff]  ;;  %v223_v3 = vld [vmem:[%s2718_s1 + $0x320] sm:$0xff] }
  0x2f   :  { %1661 = vmatprep.subr.bf16.mxu0 %v1660_v42  ;;  %418 = vmatprep.mubr.f32.mxu1 %v107_v47  ;;  %v1646_v42 = vpack.c.bf16 %v170_v35, %v169_v33  ;;  %v1678_v44 = vpack.c.bf16 %v202_v37, %v201_v36  ;;  %v1680_v45 = vpack.c.bf16 %v236_v41, %v235_v40  ;;  %v220_v47 = vld [vmem:[%s2718_s1 + $0x308] sm:$0xff]  ;;  %v36_v7 = vld [vmem:[%s2717_s0 + $0x90] sm:$0xff]  ;;  %v38_v8 = vld [vmem:[%s2717_s0 + $0xa0] sm:$0xff] }
  0x30   :  { %379 = vmatmul.mubr.f32.gmra.mrb[6].mxu0 %v42_v49  ;;  %419 = vmatmul.mubr.f32.gmra.mrb[6].mxu1 %v106_v52  ;;  %v237_v49 = vld [vmem:[%s2718_s1 + $0x390] sm:$0xff]  ;;  %v22_v52 = vld [vmem:[%s2717_s0 + $0x20] sm:$0xff] }
  0x31   :  { %1631 = vmatpush3.bf16.msra.mxu1 %v1630_v48  ;;  %1663 = vmatpush3.bf16.msra.mxu0 %v1662_v50  ;;  %v23_v48 = vld [vmem:[%s2717_s0 + $0x28] sm:$0xff]  ;;  %v238_v50 = vld [vmem:[%s2718_s1 + $0x398] sm:$0xff]  ;;  %v225_v13 = vld [vmem:[%s2718_s1 + $0x330] sm:$0xff] }
  0x32   :  { %1633 = vmatprep.subr.bf16.mxu1 %v1632_v53  ;;  %383 = vmatprep.mubr.f32.mxu0 %v51_v57  ;;  %v1682_v53 = vpack.c.bf16 %v220_v47, %v219_v46  ;;  %v1684_v55 = vpack.c.bf16 %v238_v50, %v237_v49  ;;  %v221_v57 = vld [vmem:[%s2718_s1 + $0x310] sm:$0xff]  ;;  %v1694_v21 = vpack.c.bf16 %v226_v14, %v225_v13 }
  0x33   :  { %1665 = vmatprep.subr.bf16.mxu0 %v1664_v58  ;;  %423 = vmatprep.mubr.f32.mxu1 %v115_v63  ;;  %v222_v58 = vld [vmem:[%s2718_s1 + $0x318] sm:$0xff] }
  0x34   :  { %384 = vmatmul.mubr.f32.gmra.mrb[8].mxu0 %v50_v1  ;;  %424 = vmatmul.mubr.f32.gmra.mrb[8].mxu1 %v114_v4  ;;  %v37_v63 = vld [vmem:[%s2717_s0 + $0x98] sm:$0xff]  ;;  %v1686_v1 = vpack.c.bf16 %v222_v58, %v221_v57  ;;  %v224_v4 = vld [vmem:[%s2718_s1 + $0x328] sm:$0xff] }
  0x35   :  { %1635 = vmatpush3.bf16.msra.mxu1 %v1634_v0  ;;  %1667 = vmatpush3.bf16.msra.mxu0 %v1666_v2  ;;  %v39_v0 = vld [vmem:[%s2717_s0 + $0xa8] sm:$0xff]  ;;  %v1688_v2 = vpack.c.bf16 %v240_v60, %v239_v59  ;;  %v1690_v11 = vpack.c.bf16 %v224_v4, %v223_v3 }
  0x36   :  { %1637 = vmatprep.subr.bf16.mxu1 %v1636_v5  ;;  %388 = vmatprep.mubr.f32.mxu0 %v59_v9  ;;  %v241_v5 = vld [vmem:[%s2718_s1 + $0x3b0] sm:$0xff]  ;;  %v45_v9 = vld [vmem:[%s2717_s0 + $0xd8] sm:$0xff] }
  0x37   :  { %1669 = vmatprep.subr.bf16.mxu0 %v1668_v10  ;;  %493 = vmatprep.mubr.f32.mxu1 %v21_v15  ;;  %v47_v10 = vld [vmem:[%s2717_s0 + $0xe8] sm:$0xff]  ;;  %v1692_v12 = vpack.c.bf16 %v242_v6, %v241_v5  ;;  %v243_v15 = vld [vmem:[%s2718_s1 + $0x3c0] sm:$0xff] }
  0x38   :  { %389 = vmatmul.mubr.f32.gmra.mrb[10].mxu0 %v58_v17  ;;  %v44_v17 = vld [vmem:[%s2717_s0 + $0xd0] sm:$0xff] }
  0x39   :  { %1639 = vmatpush3.bf16.msra.mxu1 %v1638_v16  ;;  %1671 = vmatpush3.bf16.msra.mxu0 %v1670_v18  ;;  %v244_v16 = vld [vmem:[%s2718_s1 + $0x3c8] sm:$0xff]  ;;  %v46_v18 = vld [vmem:[%s2717_s0 + $0xe0] sm:$0xff] }
  0x3a   :  { %1641 = vmatprep.subr.bf16.mxu1 %v1640_v20  ;;  %393 = vmatprep.mubr.f32.mxu0 %v67_v24  ;;  %v55_v20 = vld [vmem:[%s2717_s0 + $0x128] sm:$0xff] }
  0x3b   :  { %1673 = vmatprep.subr.bf16.mxu0 %v1672_v25 }
  0x3c   :  { %394 = vmatmul.mubr.f32.gmra.mrb[12].mxu0 %v66_v31 }
  0x3d   :  { %1643 = vmatpush3.bf16.msra.mxu1 %v1642_v30  ;;  %1675 = vmatpush3.bf16.msra.mxu0 %v1674_v32 }
  0x3e   :  { %1645 = vmatprep.subr.bf16.mxu1 %v1644_v34  ;;  %398 = vmatprep.mubr.f32.mxu0 %v75_v38 }
  0x3f   :  { %1677 = vmatprep.subr.bf16.mxu0 %v1676_v39 }
  0x40   :  { %399 = vmatmul.mubr.f32.gmra.mrb[14].mxu0 %v74_v43 }
  0x41   :  { %1647 = vmatpush3.bf16.msra.mxu1 %v1646_v42  ;;  %1679 = vmatpush3.bf16.msra.mxu0 %v1678_v44 }
  0x42   :  { %623 = vmatprep.mubr.f32.mxu0 %v23_v48  ;;  %1681 = vmatprep.subr.bf16.mxu1 %v1680_v45 }
  0x44   :  { %494 = vmatmul.mubr.f32.vlgmr.msra.gmra.mrb[10].mxu1 %v20_v51  ;;  %624 = vmatmul.mubr.f32.vlgmr.msra.gmra.mrb[16].mxu0 %v22_v52 }
  0x45   :  { %498 = vmatprep.mubr.f32.mxu1 %v29_v54  ;;  %1683 = vmatpush3.bf16.msra.mxu1 %v1682_v53 }
  0x46   :  { %628 = vmatprep.mubr.f32.mxu0 %v31_v56  ;;  %1685 = vmatprep.subr.bf16.mxu1 %v1684_v55 }
  0x48   :  { %499 = vmatmul.mubr.f32.gmra.mrb[12].mxu1 %v28_v61  ;;  %629 = vmatmul.mubr.f32.gmra.mrb[18].mxu0 %v30_v62 }
  0x49   :  { %503 = vmatprep.mubr.f32.mxu1 %v37_v63  ;;  %633 = vmatprep.mubr.f32.mxu0 %v39_v0 }
  0x4a   :  { %1687 = vmatpush3.bf16.msra.mxu1 %v1686_v1 }
  0x4b   :  { %1689 = vmatprep.subr.bf16.mxu1 %v1688_v2 }
  0x4c   :  { %504 = vmatmul.mubr.f32.gmra.mrb[14].mxu1 %v36_v7  ;;  %634 = vmatmul.mubr.f32.gmra.mrb[20].mxu0 %v38_v8 }
  0x4d   :  { %508 = vmatprep.mubr.f32.mxu1 %v45_v9  ;;  %638 = vmatprep.mubr.f32.mxu0 %v47_v10 }
  0x4e   :  { %1691 = vmatpush3.bf16.msra.mxu1 %v1690_v11 }
  0x4f   :  { %9 = vsyncpa [#allocation3], 0  ;;  %1693 = vmatprep.subr.bf16.mxu1 %v1692_v12  ;;  %v1696_v22 = vpack.c.bf16 %v244_v16, %v243_v15  ;;  %v227_v23 = vld [vmem:[%s2718_s1 + $0x340] sm:$0xff]  ;;  %v228_v24 = vld [vmem:[%s2718_s1 + $0x348] sm:$0xff]  ;;  %vm295_vm0 = vcmask 1043456   ;;  %vm1788_vm1 = vmmov 1  }
  0x50   :  { %509 = vmatmul.mubr.f32.gmra.mrb[16].mxu1 %v44_v17  ;;  %639 = vmatmul.mubr.f32.gmra.mrb[22].mxu0 %v46_v18  ;;  %v245_v25 = vld [vmem:[%s2718_s1 + $0x3d0] sm:$0xff]  ;;  %v246_v26 = vld [vmem:[%s2718_s1 + $0x3d8] sm:$0xff]  ;;  %v54_v28 = vld [vmem:[%s2717_s0 + $0x120] sm:$0xff]  ;;  %v1698_v31 = vpack.c.bf16 %v228_v24, %v227_v23  ;;  %vm255_vm3 = vcmask 1014784   ;;  %vm1790_vm4 = vmmov 0   ;;  %vm840_vm5 = vcmask 261120  }
  0x51   :  { %513 = vmatprep.mubr.f32.mxu1 %v53_v19  ;;  %v52_v27 = vld [vmem:[%s2717_s0 + $0x110] sm:$0xff]  ;;  %643 = vmatprep.mubr.f32.mxu0 %v55_v20  ;;  %v61_v29 = vld [vmem:[%s2717_s0 + $0x158] sm:$0xff]  ;;  %v63_v30 = vld [vmem:[%s2717_s0 + $0x168] sm:$0xff]  ;;  %v1700_v32 = vpack.c.bf16 %v246_v26, %v245_v25  ;;  %vm1136_vm7 = vcmask 811008  }
  0x52   :  { %1695 = vmatpush3.bf16.msra.mxu1 %v1694_v21  ;;  %v229_v33 = vld [vmem:[%s2718_s1 + $0x350] sm:$0xff]  ;;  %v230_v34 = vld [vmem:[%s2718_s1 + $0x358] sm:$0xff]  ;;  %v247_v35 = vld [vmem:[%s2718_s1 + $0x3e0] sm:$0xff] }
  0x53   :  { %1697 = vmatprep.subr.bf16.mxu1 %v1696_v22  ;;  %v248_v36 = vld [vmem:[%s2718_s1 + $0x3e8] sm:$0xff]  ;;  %v60_v37 = vld [vmem:[%s2717_s0 + $0x150] sm:$0xff]  ;;  %v62_v38 = vld [vmem:[%s2717_s0 + $0x160] sm:$0xff]  ;;  %v1702_v41 = vpack.c.bf16 %v230_v34, %v229_v33 }
  0x54   :  { %514 = vmatmul.mubr.f32.gmra.mrb[18].mxu1 %v52_v27  ;;  %644 = vmatmul.mubr.f32.gmra.mrb[24].mxu0 %v54_v28  ;;  %v69_v39 = vld [vmem:[%s2717_s0 + $0x198] sm:$0xff]  ;;  %v71_v40 = vld [vmem:[%s2717_s0 + $0x1a8] sm:$0xff]  ;;  %v1704_v42 = vpack.c.bf16 %v248_v36, %v247_v35  ;;  %v231_v43 = vld [vmem:[%s2718_s1 + $0x360] sm:$0xff] }
  0x55   :  { %518 = vmatprep.mubr.f32.mxu1 %v61_v29  ;;  %648 = vmatprep.mubr.f32.mxu0 %v63_v30  ;;  %v232_v44 = vld [vmem:[%s2718_s1 + $0x368] sm:$0xff]  ;;  %v249_v45 = vld [vmem:[%s2718_s1 + $0x3f0] sm:$0xff]  ;;  %v250_v46 = vld [vmem:[%s2718_s1 + $0x3f8] sm:$0xf] }
  0x56   :  { %1699 = vmatpush3.bf16.msra.mxu1 %v1698_v31  ;;  %v68_v47 = vld [vmem:[%s2717_s0 + $0x190] sm:$0xff]  ;;  %v70_v48 = vld [vmem:[%s2717_s0 + $0x1a0] sm:$0xff]  ;;  %v77_v49 = vld [vmem:[%s2717_s0 + $0x1d8] sm:$0xff]  ;;  %v1706_v51 = vpack.c.bf16 %v232_v44, %v231_v43  ;;  %v1708_v52 = vpack.c.bf16 %v250_v46, %v249_v45 }
  0x57   :  { %1701 = vmatprep.subr.bf16.mxu1 %v1700_v32  ;;  %v79_v50 = vld [vmem:[%s2717_s0 + $0x1e8] sm:$0xff]  ;;  %v233_v53 = vld [vmem:[%s2718_s1 + $0x370] sm:$0xff]  ;;  %v234_v54 = vld [vmem:[%s2718_s1 + $0x378] sm:$0xff] }
  0x58   :  { %519 = vmatmul.mubr.f32.gmra.mrb[20].mxu1 %v60_v37  ;;  %649 = vmatmul.mubr.f32.gmra.mrb[26].mxu0 %v62_v38  ;;  %vm1709_vm2 = vmpackc.low %vm295_vm0, %vm1788_vm1  ;;  %v76_v55 = vld [vmem:[%s2717_s0 + $0x1d0] sm:$0xff]  ;;  %v78_v56 = vld [vmem:[%s2717_s0 + $0x1e0] sm:$0xff]  ;;  %v1711_v59 = vpack.c.bf16 %v234_v54, %v233_v53 }
  0x59   :  { %523 = vmatprep.mubr.f32.mxu1 %v69_v39  ;;  %653 = vmatprep.mubr.f32.mxu0 %v71_v40  ;;  %v85_v57 = vld [vmem:[%s2717_s0 + $0x218] sm:$0xff]  ;;  %v87_v58 = vld [vmem:[%s2717_s0 + $0x228] sm:$0xff]  ;;  %v84_v60 = vld [vmem:[%s2717_s0 + $0x210] sm:$0xff] }
  0x5a   :  { %1703 = vmatpush3.bf16.msra.mxu1 %v1702_v41  ;;  %v86_v61 = vld [vmem:[%s2717_s0 + $0x220] sm:$0xff]  ;;  %v93_v62 = vld [vmem:[%s2717_s0 + $0x258] sm:$0xff]  ;;  %v95_v63 = vld [vmem:[%s2717_s0 + $0x268] sm:$0xff] }
  0x5b   :  { %1705 = vmatprep.subr.bf16.mxu1 %v1704_v42  ;;  %v92_v0 = vld [vmem:[%s2717_s0 + $0x250] sm:$0xff]  ;;  %v94_v1 = vld [vmem:[%s2717_s0 + $0x260] sm:$0xff]  ;;  %v101_v2 = vld [vmem:[%s2717_s0 + $0x298] sm:$0xff]  ;;  %v1789_v42 = vmov 0.0|0.0  }
  0x5c   :  { %524 = vmatmul.mubr.f32.gmra.mrb[22].mxu1 %v68_v47  ;;  %654 = vmatmul.mubr.f32.gmra.mrb[28].mxu0 %v70_v48  ;;  %v103_v3 = vld [vmem:[%s2717_s0 + $0x2a8] sm:$0xff]  ;;  %v100_v4 = vld [vmem:[%s2717_s0 + $0x290] sm:$0xff]  ;;  %v102_v5 = vld [vmem:[%s2717_s0 + $0x2a0] sm:$0xff]  ;;  %v1791_v47 = vmov 0.0  }
  0x5d   :  { %528 = vmatprep.mubr.f32.mxu1 %v77_v49  ;;  %658 = vmatprep.mubr.f32.mxu0 %v79_v50  ;;  %v109_v6 = vld [vmem:[%s2717_s0 + $0x2d8] sm:$0xff]  ;;  %v111_v7 = vld [vmem:[%s2717_s0 + $0x2e8] sm:$0xff]  ;;  %v108_v8 = vld [vmem:[%s2717_s0 + $0x2d0] sm:$0xff] }
  0x5e   :  { %1707 = vmatpush3.bf16.msra.mxu1 %v1706_v51  ;;  %v110_v9 = vld [vmem:[%s2717_s0 + $0x2e0] sm:$0xff]  ;;  %v117_v10 = vld [vmem:[%s2717_s0 + $0x318] sm:$0xf]  ;;  %v119_v11 = vld [vmem:[%s2717_s0 + $0x328] sm:$0xf]  ;;  %1713 = vmatprep.subr.bf16.mxu0 %v1789_v42 }
  0x5f   :  { %1710 = vmatprep.subr.msk.bf16.mxu1 %vm1709_vm2, %v1708_v52  ;;  %v116_v12 = vld [vmem:[%s2717_s0 + $0x310] sm:$0xf]  ;;  %v118_v13 = vld [vmem:[%s2717_s0 + $0x320] sm:$0xf]  ;;  %v25_v14 = vld [vmem:[%s2717_s0 + $0x38] sm:$0xff] }
  0x60   :  { %529 = vmatmul.mubr.f32.gmra.mrb[24].mxu1 %v76_v55  ;;  %659 = vmatmul.mubr.f32.gmra.mrb[30].mxu0 %v78_v56  ;;  %v24_v15 = vld [vmem:[%s2717_s0 + $0x30] sm:$0xff]  ;;  %v33_v16 = vld [vmem:[%s2717_s0 + $0x78] sm:$0xff]  ;;  %v832_v40 = vld [vmem:[%s2719_s2] sm:$0xff] }
  0x61   :  { %533 = vmatprep.mubr.f32.mxu1 %v85_v57  ;;  %663 = vmatprep.mubr.f32.mxu0 %v87_v58  ;;  %v32_v17 = vld [vmem:[%s2717_s0 + $0x70] sm:$0xff]  ;;  %v41_v18 = vld [vmem:[%s2717_s0 + $0xb8] sm:$0xff]  ;;  %v833_v41 = vld [vmem:[%s2719_s2 + $0x8] sm:$0xff] }
  0x62   :  { %1712 = vmatpush3.bf16.msra.mxu1 %v1711_v59  ;;  %v40_v19 = vld [vmem:[%s2717_s0 + $0xb0] sm:$0xff]  ;;  %v49_v20 = vld [vmem:[%s2717_s0 + $0xf8] sm:$0xff]  ;;  %v1714_v43 = vpack.c.bf16 %v833_v41, %v832_v40  ;;  %vm2669_vm6 = vmpackc.low %vm840_vm5, %vm840_vm5 }
  0x63   :  { %v48_v21 = vld [vmem:[%s2717_s0 + $0xf0] sm:$0xff]  ;;  %v57_v22 = vld [vmem:[%s2717_s0 + $0x138] sm:$0xff]  ;;  %1719 = vmatprep.subr.bf16.mxu1 %v1789_v42 }
  0x64   :  { %534 = vmatmul.mubr.f32.gmra.mrb[26].mxu1 %v84_v60  ;;  %664 = vmatmul.mubr.f32.gmra.mrb[32].mxu0 %v86_v61  ;;  %v56_v23 = vld [vmem:[%s2717_s0 + $0x130] sm:$0xff]  ;;  %v65_v24 = vld [vmem:[%s2717_s0 + $0x178] sm:$0xff] }
  0x65   :  { %538 = vmatprep.mubr.f32.mxu1 %v93_v62  ;;  %668 = vmatprep.mubr.f32.mxu0 %v95_v63  ;;  %v64_v25 = vld [vmem:[%s2717_s0 + $0x170] sm:$0xff]  ;;  %v73_v26 = vld [vmem:[%s2717_s0 + $0x1b8] sm:$0xff] }
  0x66   :  { %v72_v27 = vld [vmem:[%s2717_s0 + $0x1b0] sm:$0xff]  ;;  %v81_v28 = vld [vmem:[%s2717_s0 + $0x1f8] sm:$0xff]  ;;  %1715 = vmatpush3.bf16.msra.mxu0 %v1714_v43 }
  0x67   :  { %v80_v29 = vld [vmem:[%s2717_s0 + $0x1f0] sm:$0xff]  ;;  %v89_v30 = vld [vmem:[%s2717_s0 + $0x238] sm:$0xff]  ;;  %1716 = vmatprep.subr.bf16.mxu0 %v1789_v42 }
  0x68   :  { %539 = vmatmul.mubr.f32.gmra.mrb[28].mxu1 %v92_v0  ;;  %669 = vmatmul.mubr.f32.gmra.mrb[34].mxu0 %v94_v1  ;;  %v88_v31 = vld [vmem:[%s2717_s0 + $0x230] sm:$0xff]  ;;  %v97_v32 = vld [vmem:[%s2717_s0 + $0x278] sm:$0xff] }
  0x69   :  { %543 = vmatprep.mubr.f32.mxu1 %v101_v2  ;;  %673 = vmatprep.mubr.f32.mxu0 %v103_v3  ;;  %v96_v33 = vld [vmem:[%s2717_s0 + $0x270] sm:$0xff]  ;;  %v105_v34 = vld [vmem:[%s2717_s0 + $0x2b8] sm:$0xff] }
  0x6a   :  { %v104_v35 = vld [vmem:[%s2717_s0 + $0x2b0] sm:$0xff]  ;;  %v113_v36 = vld [vmem:[%s2717_s0 + $0x2f8] sm:$0xff] }
  0x6b   :  { %v112_v37 = vld [vmem:[%s2717_s0 + $0x2f0] sm:$0xff]  ;;  %v121_v38 = vld [vmem:[%s2717_s0 + $0x338] sm:$0xf] }
  0x6c   :  { %544 = vmatmul.mubr.f32.gmra.mrb[30].mxu1 %v100_v4  ;;  %674 = vmatmul.mubr.f32.gmra.mrb[36].mxu0 %v102_v5  ;;  %v120_v39 = vld [vmem:[%s2717_s0 + $0x330] sm:$0xf]  ;;  %v835_v45 = vld [vmem:[%s2719_s2 + $0x18] sm:$0xff] }
  0x6d   :  { %548 = vmatprep.mubr.f32.mxu1 %v109_v6  ;;  %678 = vmatprep.mubr.f32.mxu0 %v111_v7  ;;  %v834_v44 = vld [vmem:[%s2719_s2 + $0x10] sm:$0xff] }
  0x6e   :  { %v1717_v46 = vpack.c.bf16 %v835_v45, %v834_v44 }
  0x70   :  { %549 = vmatmul.mubr.f32.gmra.mrb[32].mxu1 %v108_v8  ;;  %679 = vmatmul.mubr.f32.gmra.mrb[38].mxu0 %v110_v9 }
  0x71   :  { %553 = vmatprep.mubr.f32.mxu1 %v117_v10  ;;  %683 = vmatprep.mubr.f32.mxu0 %v119_v11 }
  0x72   :  { %1718 = vmatpush3.bf16.msra.mxu0 %v1717_v46 }
  0x74   :  { %554 = vmatmul.mubr.f32.gmra.mrb[34].mxu1 %v116_v12  ;;  %684 = vmatmul.mubr.f32.gmra.mrb[40].mxu0 %v118_v13  ;;  %v251_v12 = vlaneseq }
  0x75   :  { %1153 = vmatprep.mubr.msk.f32.mxu1 %vm255_vm3, %v25_v14  ;;  %1516 = vmatprep.mubr.msk.f32.mxu0 %vm1790_vm4, %v1791_v47 }
  0x78   :  { %754 = vmatmul.mubr.f32.vlgmr.msra.gmra.mrb[36].mxu1 %v24_v15 }
  0x79   :  { %1154 = vmatprep.mubr.msk.f32.mxu1 %vm255_vm3, %v33_v16 }
  0x7c   :  { %759 = vmatmul.mubr.f32.gmra.mrb[38].mxu1 %v32_v17  ;;  %v2556_v17 = vshrl.u32 %v251_v12, 7 }
  0x7d   :  { %1155 = vmatprep.mubr.msk.f32.mxu1 %vm255_vm3, %v41_v18 }
  0x80   :  { %764 = vmatmul.mubr.f32.gmra.mrb[40].mxu1 %v40_v19 }
  0x81   :  { %1156 = vmatprep.mubr.msk.f32.mxu1 %vm255_vm3, %v49_v20 }
  0x84   :  { %769 = vmatmul.mubr.f32.gmra.mrb[42].mxu1 %v48_v21  ;;  %v253_v21 = vsub.s32 0, %v2556_v17 }
  0x85   :  { %1157 = vmatprep.mubr.msk.f32.mxu1 %vm255_vm3, %v57_v22 }
  0x88   :  { %774 = vmatmul.mubr.f32.gmra.mrb[44].mxu1 %v56_v23  ;;  %v2562_v23 = vld [vmem:[%s2720_s3] sm:$0x7]  ;;  %s1792_s3 = smov [#allocation2]  }
  0x89   :  { %1158 = vmatprep.mubr.msk.f32.mxu1 %vm255_vm3, %v65_v24  ;;  %s1144_s15 = sshll.u32 %s1792_s3, 4  ;;  %s1145_s15 = int_to_ptr.vmem [resolvable:$true] %s1144_s15 }
  0x8a   :  { %s1764_s16 = scalar_lea.vmem %s1145_s15, 16  ;;  %s1768_s17 = scalar_lea.vmem %s1145_s15, 32 }
  0x8b   :  { %p1765_p0 = scmp.ne.s32.totalorder %s1145_s15, %s1764_s16  ;;  %p1769_p1 = scmp.lt.s32.totalorder %s1145_s15, %s1145_s15 }
  0x8c   :  { %779 = vmatmul.mubr.f32.gmra.mrb[46].mxu1 %v64_v25  ;;  %p1770_p2 = scmp.lt.s32.totalorder %s1768_s17, %s1764_s16 }
  0x8d   :  { %1159 = vmatprep.mubr.msk.f32.mxu1 %vm255_vm3, %v73_v26  ;;  %v2565_v26 = vrot.slane %v2562_v23, %v253_v21 }
  0x8e   :  { %p1771_p3 = por %p1770_p2, %p1769_p1 }
  0x90   :  { %784 = vmatmul.mubr.f32.gmra.mrb[48].mxu1 %v72_v27  ;;  %p1772_p4 = pnand %p1771_p3, %p1765_p0 }
  0x91   :  { %1160 = vmatprep.mubr.msk.f32.mxu1 %vm255_vm3, %v81_v28 }
  0x94   :  { %789 = vmatmul.mubr.f32.gmra.mrb[50].mxu1 %v80_v29 }
  0x95   :  { %1161 = vmatprep.mubr.msk.f32.mxu1 %vm255_vm3, %v89_v30 }
  0x98   :  { %794 = vmatmul.mubr.f32.gmra.mrb[52].mxu1 %v88_v31 }
  0x99   :  { %1162 = vmatprep.mubr.msk.f32.mxu1 %vm255_vm3, %v97_v32 }
  0x9c   :  { %799 = vmatmul.mubr.f32.gmra.mrb[54].mxu1 %v96_v33 }
  0x9d   :  { %1163 = vmatprep.mubr.msk.f32.mxu1 %vm255_vm3, %v105_v34 }
  0xa0   :  { %804 = vmatmul.mubr.f32.gmra.mrb[56].mxu1 %v104_v35 }
  0xa1   :  { %1164 = vmatprep.mubr.msk.f32.mxu1 %vm255_vm3, %v113_v36 }
  0xa4   :  { %809 = vmatmul.mubr.f32.gmra.mrb[58].mxu1 %v112_v37 }
  0xa5   :  { %1165 = vmatprep.mubr.msk.f32.mxu1 %vm255_vm3, %v121_v38 }
  0xa8   :  { %814 = vmatmul.mubr.f32.gmra.mrb[60].mxu1 %v120_v39 }
  0xa9   :  { %1581 = vmatprep.mubr.msk.f32.mxu1 %vm1790_vm4, %v1791_v47 }
  0xf7   :  { %v1249_v48 = vpop.f32.mrb[0].mxu1  ;;  %v1225_v49 = vpop.f32.mrb[0].mxu0 }
  0xf8   :  { %v1250_v50 = vpop.f32.mrb[1].mxu1  ;;  %v1226_v51 = vpop.f32.mrb[1].mxu0 }
  0xf9   :  { %v2546_v52 = vadd.f32 %v1250_v50, %v1249_v48  ;;  %v1227_v53 = vadd.f32 %v1226_v51, %v1225_v49 }
  0xfb   :  { %v1252_v54 = vpop.f32.mrb[2].mxu1  ;;  %v1228_v55 = vpop.f32.mrb[2].mxu0  ;;  %v366_v28 = vadd.f32 %v1227_v53, %v2565_v26 }
  0xfc   :  { %v1253_v56 = vpop.f32.mrb[3].mxu1  ;;  %v1229_v57 = vpop.f32.mrb[3].mxu0 }
  0xfd   :  { %v2548_v58 = vadd.f32 %v1253_v56, %v1252_v54  ;;  %v1230_v59 = vadd.f32 %v1229_v57, %v1228_v55 }
  0xff   :  { %v1255_v60 = vpop.f32.mrb[4].mxu1  ;;  %v1231_v61 = vpop.f32.mrb[4].mxu0  ;;  %v371_v35 = vadd.f32 %v1230_v59, %v2565_v26 }
 0x100   :  { %v1256_v62 = vpop.f32.mrb[5].mxu1  ;;  %v1232_v63 = vpop.f32.mrb[5].mxu0 }
 0x101   :  { %v2550_v0 = vadd.f32 %v1256_v62, %v1255_v60  ;;  %v1233_v1 = vadd.f32 %v1232_v63, %v1231_v61 }
 0x103   :  { %v1258_v2 = vpop.f32.mrb[6].mxu1  ;;  %v1234_v3 = vpop.f32.mrb[6].mxu0  ;;  %v376_v45 = vadd.f32 %v1233_v1, %v2565_v26 }
 0x104   :  { %v1259_v4 = vpop.f32.mrb[7].mxu1  ;;  %v1235_v5 = vpop.f32.mrb[7].mxu0 }
 0x105   :  { %v2552_v6 = vadd.f32 %v1259_v4, %v1258_v2  ;;  %v1236_v7 = vadd.f32 %v1235_v5, %v1234_v3 }
 0x107   :  { %v1237_v8 = vpop.f32.mrb[8].mxu0  ;;  %v1261_v9 = vpop.f32.mrb[8].mxu1  ;;  %v381_v56 = vadd.f32 %v1236_v7, %v2565_v26 }
 0x108   :  { %v1238_v10 = vpop.f32.mrb[9].mxu0  ;;  %v1262_v11 = vpop.f32.mrb[9].mxu1 }
 0x109   :  { %v1239_v13 = vadd.f32 %v1238_v10, %v1237_v8  ;;  %v2554_v14 = vadd.f32 %v1262_v11, %v1261_v9 }
 0x10b   :  { %v1240_v15 = vpop.f32.mrb[10].mxu0  ;;  %v386_v3 = vadd.f32 %v1239_v13, %v2565_v26 }
 0x10c   :  { %v1241_v16 = vpop.f32.mrb[11].mxu0 }
 0x10d   :  { %v1242_v18 = vadd.f32 %v1241_v16, %v1240_v15 }
 0x10f   :  { %v1243_v19 = vpop.f32.mrb[12].mxu0  ;;  %v391_v15 = vadd.f32 %v1242_v18, %v2565_v26 }
 0x110   :  { %v1244_v20 = vpop.f32.mrb[13].mxu0 }
 0x111   :  { %v1245_v22 = vadd.f32 %v1244_v20, %v1243_v19 }
 0x113   :  { %v1246_v24 = vpop.f32.mrb[14].mxu0 }
 0x114   :  { %v1247_v25 = vpop.f32.mrb[15].mxu0 }
 0x115   :  { %v1248_v27 = vadd.f32 %v1247_v25, %v1246_v24 }
 0x117   :  { %v1296_v29 = vpop.f32.mrb[10].mxu1  ;;  %v1367_v30 = vpop.f32.mrb[16].mxu0 }
 0x118   :  { %v1297_v31 = vpop.f32.mrb[11].mxu1  ;;  %v1368_v32 = vpop.f32.mrb[17].mxu0 }
 0x119   :  { %v1298_v33 = vadd.f32 %v1297_v31, %v1296_v29  ;;  %v1369_v34 = vadd.f32 %v1368_v32, %v1367_v30  ;;  %v396_v29 = vadd.f32 %v1245_v22, %v2565_v26 }
 0x11b   :  { %v496_v36 = vadd.f32 %v1298_v33, %v366_v28  ;;  %v1299_v37 = vpop.f32.mrb[12].mxu1  ;;  %v1370_v38 = vpop.f32.mrb[18].mxu0 }
 0x11c   :  { %v1300_v39 = vpop.f32.mrb[13].mxu1  ;;  %v1371_v40 = vpop.f32.mrb[19].mxu0 }
 0x11d   :  { %v2569_v41 = vadd.f32 %v1369_v34, %v496_v36  ;;  %v1301_v43 = vadd.f32 %v1300_v39, %v1299_v37  ;;  %v1372_v44 = vadd.f32 %v1371_v40, %v1370_v38  ;;  %v401_v37 = vadd.f32 %v1248_v27, %v2565_v26 }
 0x11f   :  { %v501_v46 = vadd.f32 %v1301_v43, %v371_v35  ;;  %v1302_v48 = vpop.f32.mrb[14].mxu1  ;;  %v1373_v49 = vpop.f32.mrb[20].mxu0 }
 0x120   :  { %v1303_v50 = vpop.f32.mrb[15].mxu1  ;;  %v1374_v51 = vpop.f32.mrb[21].mxu0 }
 0x121   :  { %v2572_v53 = vadd.f32 %v1372_v44, %v501_v46  ;;  %v1304_v54 = vadd.f32 %v1303_v50, %v1302_v48  ;;  %v1375_v55 = vadd.f32 %v1374_v51, %v1373_v49 }
 0x123   :  { %v506_v57 = vadd.f32 %v1304_v54, %v376_v45  ;;  %v1305_v59 = vpop.f32.mrb[16].mxu1  ;;  %v1376_v60 = vpop.f32.mrb[22].mxu0 }
 0x124   :  { %v1306_v61 = vpop.f32.mrb[17].mxu1  ;;  %v1377_v62 = vpop.f32.mrb[23].mxu0 }
 0x125   :  { %v2575_v63 = vadd.f32 %v1375_v55, %v506_v57  ;;  %v1307_v2 = vadd.f32 %v1306_v61, %v1305_v59  ;;  %v1378_v1 = vadd.f32 %v1377_v62, %v1376_v60  ;;  %v406_v55 = vadd.f32 %v2546_v52, %v2565_v26 }
 0x127   :  { %v511_v4 = vadd.f32 %v1307_v2, %v381_v56  ;;  %v1308_v5 = vpop.f32.mrb[18].mxu1  ;;  %v1379_v8 = vpop.f32.mrb[24].mxu0 }
 0x128   :  { %v1309_v9 = vpop.f32.mrb[19].mxu1  ;;  %v1380_v10 = vpop.f32.mrb[25].mxu0 }
 0x129   :  { %v2578_v11 = vadd.f32 %v1378_v1, %v511_v4  ;;  %v1310_v12 = vadd.f32 %v1309_v9, %v1308_v5  ;;  %v1381_v7 = vadd.f32 %v1380_v10, %v1379_v8  ;;  %v411_v1 = vadd.f32 %v2548_v58, %v2565_v26 }
 0x12b   :  { %v516_v16 = vadd.f32 %v1310_v12, %v386_v3  ;;  %v1311_v19 = vpop.f32.mrb[20].mxu1  ;;  %v1382_v20 = vpop.f32.mrb[26].mxu0 }
 0x12c   :  { %v1312_v21 = vpop.f32.mrb[21].mxu1  ;;  %v1383_v24 = vpop.f32.mrb[27].mxu0 }
 0x12d   :  { %v2581_v25 = vadd.f32 %v1381_v7, %v516_v16  ;;  %v1313_v28 = vadd.f32 %v1312_v21, %v1311_v19  ;;  %v1384_v13 = vadd.f32 %v1383_v24, %v1382_v20  ;;  %v416_v7 = vadd.f32 %v2550_v0, %v2565_v26 }
 0x12f   :  { %v521_v30 = vadd.f32 %v1313_v28, %v391_v15  ;;  %v1314_v31 = vpop.f32.mrb[22].mxu1  ;;  %v1385_v32 = vpop.f32.mrb[28].mxu0 }
 0x130   :  { %v1315_v33 = vpop.f32.mrb[23].mxu1  ;;  %v1386_v34 = vpop.f32.mrb[29].mxu0 }
 0x131   :  { %v2584_v35 = vadd.f32 %v1384_v13, %v521_v30  ;;  %v1316_v36 = vadd.f32 %v1315_v33, %v1314_v31  ;;  %v1387_v18 = vadd.f32 %v1386_v34, %v1385_v32  ;;  %v421_v13 = vadd.f32 %v2552_v6, %v2565_v26 }
 0x133   :  { %v526_v38 = vadd.f32 %v1316_v36, %v396_v29  ;;  %v1317_v39 = vpop.f32.mrb[24].mxu1  ;;  %v1388_v40 = vpop.f32.mrb[30].mxu0 }
 0x134   :  { %v1318_v43 = vpop.f32.mrb[25].mxu1  ;;  %v1389_v44 = vpop.f32.mrb[31].mxu0 }
 0x135   :  { %v2587_v45 = vadd.f32 %v1387_v18, %v526_v38  ;;  %v1319_v46 = vadd.f32 %v1318_v43, %v1317_v39  ;;  %v1390_v22 = vadd.f32 %v1389_v44, %v1388_v40  ;;  %v426_v18 = vadd.f32 %v2554_v14, %v2565_v26 }
 0x137   :  { %v531_v48 = vadd.f32 %v1319_v46, %v401_v37  ;;  %v1320_v49 = vpop.f32.mrb[26].mxu1  ;;  %v1391_v50 = vpop.f32.mrb[32].mxu0 }
 0x138   :  { %v1321_v51 = vpop.f32.mrb[27].mxu1  ;;  %v1392_v54 = vpop.f32.mrb[33].mxu0 }
 0x139   :  { %v2591_v56 = vadd.f32 %v1390_v22, %v531_v48  ;;  %v1322_v27 = vadd.f32 %v1321_v51, %v1320_v49  ;;  %v1393_v57 = vadd.f32 %v1392_v54, %v1391_v50 }
 0x13b   :  { %v536_v59 = vadd.f32 %v1322_v27, %v406_v55  ;;  %v1323_v60 = vpop.f32.mrb[28].mxu1  ;;  %v1394_v61 = vpop.f32.mrb[34].mxu0 }
 0x13c   :  { %v1324_v62 = vpop.f32.mrb[29].mxu1  ;;  %v1395_v2 = vpop.f32.mrb[35].mxu0 }
 0x13d   :  { %v2595_v3 = vadd.f32 %v1393_v57, %v536_v59  ;;  %v1325_v4 = vadd.f32 %v1324_v62, %v1323_v60  ;;  %v1396_v5 = vadd.f32 %v1395_v2, %v1394_v61 }
 0x13f   :  { %v541_v8 = vadd.f32 %v1325_v4, %v411_v1  ;;  %v1326_v9 = vpop.f32.mrb[30].mxu1  ;;  %v1397_v10 = vpop.f32.mrb[36].mxu0 }
 0x140   :  { %v1327_v52 = vpop.f32.mrb[31].mxu1  ;;  %v1398_v12 = vpop.f32.mrb[37].mxu0 }
 0x141   :  { %v2599_v15 = vadd.f32 %v1396_v5, %v541_v8  ;;  %v1328_v16 = vadd.f32 %v1327_v52, %v1326_v9  ;;  %v1399_v19 = vadd.f32 %v1398_v12, %v1397_v10 }
 0x143   :  { %v546_v20 = vadd.f32 %v1328_v16, %v416_v7  ;;  %v1329_v21 = vpop.f32.mrb[32].mxu1  ;;  %v1400_v24 = vpop.f32.mrb[38].mxu0 }
 0x144   :  { %v1330_v58 = vpop.f32.mrb[33].mxu1  ;;  %v1401_v28 = vpop.f32.mrb[39].mxu0 }
 0x145   :  { %v2603_v29 = vadd.f32 %v1399_v19, %v546_v20  ;;  %v1331_v30 = vadd.f32 %v1330_v58, %v1329_v21  ;;  %v1402_v31 = vadd.f32 %v1401_v28, %v1400_v24 }
 0x147   :  { %v551_v32 = vadd.f32 %v1331_v30, %v421_v13  ;;  %v1332_v33 = vpop.f32.mrb[34].mxu1  ;;  %v1403_v34 = vpop.f32.mrb[40].mxu0 }
 0x148   :  { %v1333_v0 = vpop.f32.mrb[35].mxu1  ;;  %v1404_v36 = vpop.f32.mrb[41].mxu0 }
 0x149   :  { %v2607_v37 = vadd.f32 %v1402_v31, %v551_v32  ;;  %v1334_v38 = vadd.f32 %v1333_v0, %v1332_v33  ;;  %v1405_v39 = vadd.f32 %v1404_v36, %v1403_v34 }
 0x14b   :  { %v556_v40 = vadd.f32 %v1334_v38, %v426_v18  ;;  %v1438_v43 = vpop.f32.mrb[36].mxu1 }
 0x14c   :  { %v1439_v44 = vpop.f32.mrb[37].mxu1 }
 0x14d   :  { %v2609_v6 = vadd.f32 %v1405_v39, %v556_v40  ;;  %v1440_v46 = vadd.f32 %v1439_v44, %v1438_v43 }
 0x14f   :  { %v756_v22 = vadd.f32 %v1440_v46, %v2569_v41  ;;  %v1441_v48 = vpop.f32.mrb[38].mxu1 }
 0x150   :  { %v1442_v49 = vpop.f32.mrb[39].mxu1 }
 0x151   :  { %v819_v50 = vmax.f32 %v756_v22, 0.0  ;;  %v1443_v51 = vadd.f32 %v1442_v49, %v1441_v48 }
 0x153   :  { %v761_v54 = vadd.f32 %v1443_v51, %v2572_v53  ;;  %v1444_v14 = vpop.f32.mrb[40].mxu1  ;;  %1517 = vmatmul.mubr.msk.f32.vlgmr.msra.gmra.mrb[42].mxu0 %vm840_vm5, %v819_v50 }
 0x154   :  { %v1445_v26 = vpop.f32.mrb[41].mxu1  ;;  %1519 = vmatprep.mubr.msk.f32.mxu0 %vm1790_vm4, %v1791_v47 }
 0x155   :  { %v820_v55 = vmax.f32 %v761_v54, 0.0  ;;  %v1446_v27 = vadd.f32 %v1445_v26, %v1444_v14 }
 0x157   :  { %v766_v57 = vadd.f32 %v1446_v27, %v2575_v63  ;;  %v1447_v59 = vpop.f32.mrb[42].mxu1  ;;  %1520 = vmatmul.mubr.msk.f32.gmra.mrb[44].mxu0 %vm840_vm5, %v820_v55 }
 0x158   :  { %v1448_v41 = vpop.f32.mrb[43].mxu1  ;;  %1522 = vmatprep.mubr.msk.f32.mxu0 %vm1790_vm4, %v1791_v47 }
 0x159   :  { %v821_v60 = vmax.f32 %v766_v57, 0.0  ;;  %v1449_v53 = vadd.f32 %v1448_v41, %v1447_v59 }
 0x15b   :  { %v771_v61 = vadd.f32 %v1449_v53, %v2578_v11  ;;  %v1450_v62 = vpop.f32.mrb[44].mxu1  ;;  %1523 = vmatmul.mubr.msk.f32.gmra.mrb[46].mxu0 %vm840_vm5, %v821_v60 }
 0x15c   :  { %v1451_v2 = vpop.f32.mrb[45].mxu1  ;;  %1525 = vmatprep.mubr.msk.f32.mxu0 %vm1790_vm4, %v1791_v47 }
 0x15d   :  { %v822_v1 = vmax.f32 %v771_v61, 0.0  ;;  %v1452_v63 = vadd.f32 %v1451_v2, %v1450_v62 }
 0x15f   :  { %v776_v4 = vadd.f32 %v1452_v63, %v2581_v25  ;;  %v1453_v5 = vpop.f32.mrb[46].mxu1  ;;  %1526 = vmatmul.mubr.msk.f32.gmra.mrb[48].mxu0 %vm840_vm5, %v822_v1 }
 0x160   :  { %v1454_v8 = vpop.f32.mrb[47].mxu1  ;;  %1528 = vmatprep.mubr.msk.f32.mxu0 %vm1790_vm4, %v1791_v47 }
 0x161   :  { %v823_v9 = vmax.f32 %v776_v4, 0.0  ;;  %v1455_v11 = vadd.f32 %v1454_v8, %v1453_v5 }
 0x163   :  { %v781_v10 = vadd.f32 %v1455_v11, %v2584_v35  ;;  %v1456_v52 = vpop.f32.mrb[48].mxu1  ;;  %1529 = vmatmul.mubr.msk.f32.gmra.mrb[50].mxu0 %vm840_vm5, %v823_v9 }
 0x164   :  { %v1457_v12 = vpop.f32.mrb[49].mxu1  ;;  %1531 = vmatprep.mubr.msk.f32.mxu0 %vm1790_vm4, %v1791_v47 }
 0x165   :  { %v824_v7 = vmax.f32 %v781_v10, 0.0  ;;  %v1458_v25 = vadd.f32 %v1457_v12, %v1456_v52 }
 0x167   :  { %v786_v16 = vadd.f32 %v1458_v25, %v2587_v45  ;;  %v1459_v19 = vpop.f32.mrb[50].mxu1  ;;  %1532 = vmatmul.mubr.msk.f32.gmra.mrb[52].mxu0 %vm840_vm5, %v824_v7 }
 0x168   :  { %v1460_v20 = vpop.f32.mrb[51].mxu1  ;;  %1534 = vmatprep.mubr.msk.f32.mxu0 %vm1790_vm4, %v1791_v47 }
 0x169   :  { %v825_v21 = vmax.f32 %v786_v16, 0.0  ;;  %v1461_v35 = vadd.f32 %v1460_v20, %v1459_v19 }
 0x16b   :  { %v791_v24 = vadd.f32 %v1461_v35, %v2591_v56  ;;  %v1462_v58 = vpop.f32.mrb[52].mxu1  ;;  %1535 = vmatmul.mubr.msk.f32.gmra.mrb[54].mxu0 %vm840_vm5, %v825_v21 }
 0x16c   :  { %v1463_v28 = vpop.f32.mrb[53].mxu1  ;;  %1537 = vmatprep.mubr.msk.f32.mxu0 %vm1790_vm4, %v1791_v47 }
 0x16d   :  { %v826_v13 = vmax.f32 %v791_v24, 0.0  ;;  %v1464_v45 = vadd.f32 %v1463_v28, %v1462_v58 }
 0x16f   :  { %v796_v30 = vadd.f32 %v1464_v45, %v2595_v3  ;;  %v1465_v31 = vpop.f32.mrb[54].mxu1  ;;  %1538 = vmatmul.mubr.msk.f32.gmra.mrb[56].mxu0 %vm840_vm5, %v826_v13 }
 0x170   :  { %v1466_v32 = vpop.f32.mrb[55].mxu1  ;;  %1540 = vmatprep.mubr.msk.f32.mxu0 %vm1790_vm4, %v1791_v47 }
 0x171   :  { %v827_v33 = vmax.f32 %v796_v30, 0.0  ;;  %v1467_v56 = vadd.f32 %v1466_v32, %v1465_v31 }
 0x173   :  { %v801_v34 = vadd.f32 %v1467_v56, %v2599_v15  ;;  %v1468_v0 = vpop.f32.mrb[56].mxu1  ;;  %1541 = vmatmul.mubr.msk.f32.gmra.mrb[58].mxu0 %vm840_vm5, %v827_v33 }
 0x174   :  { %v1469_v36 = vpop.f32.mrb[57].mxu1  ;;  %1543 = vmatprep.mubr.msk.f32.mxu0 %vm1790_vm4, %v1791_v47 }
 0x175   :  { %v828_v18 = vmax.f32 %v801_v34, 0.0  ;;  %v1470_v3 = vadd.f32 %v1469_v36, %v1468_v0 }
 0x177   :  { %v806_v38 = vadd.f32 %v1470_v3, %v2603_v29  ;;  %v1471_v39 = vpop.f32.mrb[58].mxu1  ;;  %1544 = vmatmul.mubr.msk.f32.gmra.mrb[60].mxu0 %vm840_vm5, %v828_v18 }
 0x178   :  { %v1472_v40 = vpop.f32.mrb[59].mxu1  ;;  %1546 = vmatprep.mubr.msk.f32.mxu0 %vm1790_vm4, %v1791_v47 }
 0x179   :  { %v829_v43 = vmax.f32 %v806_v38, 0.0  ;;  %v1473_v15 = vadd.f32 %v1472_v40, %v1471_v39 }
 0x17b   :  { %v811_v44 = vadd.f32 %v1473_v15, %v2607_v37  ;;  %v1474_v46 = vpop.f32.mrb[60].mxu1  ;;  %1547 = vmatmul.mubr.msk.f32.gmra.mrb[62].mxu0 %vm840_vm5, %v829_v43  ;;  %v838_v37 = vsub.s32 1, %v2556_v17 }
 0x17c   :  { %v1475_v22 = vpop.f32.mrb[61].mxu1  ;;  %1549 = vmatprep.mubr.msk.f32.mxu0 %vm1790_vm4, %v1791_v47 }
 0x17d   :  { %v830_v48 = vmax.f32 %v811_v44, 0.0  ;;  %v1476_v29 = vadd.f32 %v1475_v22, %v1474_v46  ;;  %v2663_v51 = vrot.slane %v2562_v23, %v838_v37  ;;  %v1024_v37 = vrot.slane %v2562_v23, 2 }
 0x17f   :  { %v816_v49 = vadd.f32 %v1476_v29, %v2609_v6  ;;  %1550 = vmatmul.mubr.msk.f32.gmra.mrb[64].mxu0 %vm840_vm5, %v830_v48 }
 0x180   :  { %1552 = vmatprep.mubr.msk.f32.mxu0 %vm1790_vm4, %v1791_v47 }
 0x181   :  { %v831_v50 = vmax.f32 %v816_v49, 0.0 }
 0x183   :  { %1553 = vmatmul.mubr.msk.f32.gmra.mrb[66].mxu0 %vm840_vm5, %v831_v50 }
 0x226   :  { %v946_v54 = vpop.f32.mrb[42].mxu0 }
 0x227   :  { %v1518_v14 = vpop.f32.mrb[43].mxu0  ;;  %v947_v26 = vadd.f32 %v946_v54, %v2663_v51 }
 0x229   :  { %v1010_v57 = vmax.f32 %v947_v26, 0.0 }
 0x22a   :  { %v951_v55 = vpop.f32.mrb[44].mxu0 }
 0x22b   :  { %v952_v6 = vadd.f32 %v951_v55, %v2663_v51  ;;  %v1521_v27 = vpop.f32.mrb[45].mxu0 }
 0x22d   :  { %v1011_v59 = vmax.f32 %v952_v6, 0.0 }
 0x22e   :  { %v956_v41 = vpop.f32.mrb[46].mxu0 }
 0x22f   :  { %v1720_v17 = vpack.c.bf16 %v1011_v59, %v1010_v57  ;;  %v1524_v53 = vpop.f32.mrb[47].mxu0  ;;  %v957_v61 = vadd.f32 %v956_v41, %v2663_v51 }
 0x231   :  { %1722 = vmatpush3.bf16.xpose.msk.msra.mxu1 %vm2669_vm6, %v1720_v17  ;;  %v1012_v63 = vmax.f32 %v957_v61, 0.0 }
 0x232   :  { %v961_v62 = vpop.f32.mrb[48].mxu0  ;;  %1723 = vmatprep.subr.bf16.mxu1 %v1789_v42 }
 0x233   :  { %v962_v2 = vadd.f32 %v961_v62, %v2663_v51  ;;  %v1527_v1 = vpop.f32.mrb[49].mxu0 }
 0x235   :  { %v1013_v4 = vmax.f32 %v962_v2, 0.0 }
 0x236   :  { %v966_v5 = vpop.f32.mrb[50].mxu0 }
 0x237   :  { %v1724_v8 = vpack.c.bf16 %v1013_v4, %v1012_v63  ;;  %v1530_v9 = vpop.f32.mrb[51].mxu0  ;;  %v967_v11 = vadd.f32 %v966_v5, %v2663_v51 }
 0x239   :  { %1726 = vmatpush3.bf16.xpose.msk.msra.mxu1 %vm2669_vm6, %v1724_v8  ;;  %v1014_v7 = vmax.f32 %v967_v11, 0.0 }
 0x23a   :  { %v971_v10 = vpop.f32.mrb[52].mxu0  ;;  %1727 = vmatprep.subr.bf16.mxu1 %v1789_v42 }
 0x23b   :  { %v972_v52 = vadd.f32 %v971_v10, %v2663_v51  ;;  %v1533_v12 = vpop.f32.mrb[53].mxu0 }
 0x23d   :  { %v1015_v25 = vmax.f32 %v972_v52, 0.0 }
 0x23e   :  { %v976_v16 = vpop.f32.mrb[54].mxu0 }
 0x23f   :  { %v1728_v19 = vpack.c.bf16 %v1015_v25, %v1014_v7  ;;  %v1536_v20 = vpop.f32.mrb[55].mxu0  ;;  %v977_v21 = vadd.f32 %v976_v16, %v2663_v51 }
 0x241   :  { %1730 = vmatpush3.bf16.xpose.msk.msra.mxu1 %vm2669_vm6, %v1728_v19  ;;  %v1016_v28 = vmax.f32 %v977_v21, 0.0 }
 0x242   :  { %v981_v35 = vpop.f32.mrb[56].mxu0  ;;  %1731 = vmatprep.subr.bf16.mxu1 %v1789_v42 }
 0x243   :  { %v982_v24 = vadd.f32 %v981_v35, %v2663_v51  ;;  %v1539_v58 = vpop.f32.mrb[57].mxu0 }
 0x245   :  { %v1017_v13 = vmax.f32 %v982_v24, 0.0 }
 0x246   :  { %v986_v45 = vpop.f32.mrb[58].mxu0 }
 0x247   :  { %v1732_v30 = vpack.c.bf16 %v1017_v13, %v1016_v28  ;;  %v1542_v31 = vpop.f32.mrb[59].mxu0  ;;  %v987_v32 = vadd.f32 %v986_v45, %v2663_v51 }
 0x249   :  { %1734 = vmatpush3.bf16.xpose.msk.msra.mxu1 %vm2669_vm6, %v1732_v30  ;;  %v1018_v0 = vmax.f32 %v987_v32, 0.0 }
 0x24a   :  { %v991_v33 = vpop.f32.mrb[60].mxu0  ;;  %1735 = vmatprep.subr.bf16.mxu1 %v1789_v42 }
 0x24b   :  { %v992_v56 = vadd.f32 %v991_v33, %v2663_v51  ;;  %v1545_v34 = vpop.f32.mrb[61].mxu0 }
 0x24d   :  { %v1019_v36 = vmax.f32 %v992_v56, 0.0 }
 0x24e   :  { %v996_v18 = vpop.f32.mrb[62].mxu0 }
 0x24f   :  { %v1736_v3 = vpack.c.bf16 %v1019_v36, %v1018_v0  ;;  %v1548_v38 = vpop.f32.mrb[63].mxu0  ;;  %v997_v39 = vadd.f32 %v996_v18, %v2663_v51 }
 0x251   :  { %1738 = vmatpush3.bf16.xpose.msk.msra.mxu1 %vm2669_vm6, %v1736_v3  ;;  %v1020_v44 = vmax.f32 %v997_v39, 0.0 }
 0x252   :  { %v1001_v40 = vpop.f32.mrb[64].mxu0  ;;  %1739 = vmatprep.subr.bf16.mxu1 %v1789_v42 }
 0x253   :  { %v1002_v43 = vadd.f32 %v1001_v40, %v2663_v51  ;;  %v1551_v15 = vpop.f32.mrb[65].mxu0 }
 0x255   :  { %v1021_v46 = vmax.f32 %v1002_v43, 0.0 }
 0x256   :  { %v1006_v22 = vpop.f32.mrb[66].mxu0 }
 0x257   :  { %v1740_v48 = vpack.c.bf16 %v1021_v46, %v1020_v44  ;;  %v1554_v29 = vpop.f32.mrb[67].mxu0  ;;  %v1007_v49 = vadd.f32 %v1006_v22, %v2663_v51 }
 0x259   :  { %1742 = vmatpush3.bf16.xpose.msk.msra.mxu1 %vm2669_vm6, %v1740_v48  ;;  %v1022_v50 = vmax.f32 %v1007_v49, 0.0 }
 0x25a   :  { %1579 = vmatprep.subr.mxu1 %v1791_v47 }
 0x261   :  { %1580 = vmatpush3.xpose.msk.msra.mxu1 %vm840_vm5, %v1022_v50 }
 0x264   :  { %1582 = vmatmul.mubr.msk.f32.vlgmr.msra.gmra.mrb[62].mxu1 %vm840_vm5, %v1024_v37 }
 0x337   :  { %v1132_v42 = vpop.f32.mrb[62].mxu1 }
 0x338   :  { %1137 = vst.msk [vmem:[#allocation2] sm:$0x1] %vm1136_vm7, %v1132_v42  ;;  %v1583_v54 = vpop.f32.mrb[63].mxu1 }
 0x339   :  { %1775 = shalt.err (!%p1772_p4)
}
 0x33a   :  { %s1776_s20 = scalar_lea.hbm %s2721_s4, 16 }
 0x33b   :  { %p1777_p5 = scmp.ne.s32.totalorder %s2721_s4, %s1776_s20  ;;  %p1780_p6 = scmp.lt.u32.totalorder %s1776_s20, %s2721_s4 }
 0x33d   :  { %p1782_p7 = pnand %p1780_p6, %p1777_p5 }
 0x33f   :  { %1785 = shalt.err (!%p1782_p7)
}
 0x340   :  { %1147 = dma.vmem_to_hbm [thread:$0]  %s1145_s15, 16, %s2721_s4, [#allocation3]  }
 0x341   :  { %1786 = dma.done.wait [#allocation3], 16  }
 0x342   :  { %1787 = vsyncadd [#allocation3], 4294967280 }
 0x343   :  { %1151 = vsyncpa [#allocation3], 1 }

</bundles_post_ra>
